<compile_context>
chip_gen: v7x
topology: tpu7x:2x2x1
jax: 0.10.0
libtpu: 0.0.40
codegen_flags: <defaults>
</compile_context>

<pallas_src>
import math

import jax
import jax.numpy as jnp
from jax.experimental import pallas as pl
from jax.experimental.pallas import tpu as pltpu


def _round_up(x, m):
    return ((x + m - 1) // m) * m


def _discrimiter4_kernel(x_ref, w_ref, b_ref, o_ref):
    # x_ref: (TM, NPAD) bf16 | w_ref: (NPAD, 1) bf16 | b_ref: (1,) f32 in SMEM
    # o_ref: (TM, 1) f32
    logits = jnp.dot(x_ref[...], w_ref[...],
                     preferred_element_type=jnp.float32)      # MXU, f32 accumulate
    logits = logits + b_ref[0]                                # scalar bias from SMEM
    # sigmoid(z) = 1 / (1 + exp(-z)); exp and approx reciprocal both run on the EUP.
    o_ref[...] = pl.reciprocal(1.0 + jnp.exp(-logits), approx=True).astype(o_ref.dtype)


def discrimiter4_forward(x, w, b, *, tm_max=1024):
    """y = sigmoid(x @ w + b).  x: (B, N), w: (N, 1), b: (1,).  Returns (B, 1) f32."""
    B, N = x.shape
    assert w.shape[0] == N

    # ---- Layout prep (cheap, once, outside the kernel) -----------------------
    n_pad = _round_up(N, 128)                 # 200 -> 256: aligned, unmasked loads
    tm = min(tm_max, _round_up(B, 8))         # clamp tile for tiny batches
    b_pad = _round_up(B, tm)                  # every grid block is full

    # bf16 halves HBM traffic on the bandwidth-bound x read; MXU accumulates in f32.
    x_p = jnp.pad(x, ((0, b_pad - B), (0, n_pad - N))).astype(jnp.bfloat16)
    w_p = jnp.pad(jnp.reshape(w, (N, 1)), ((0, n_pad - N), (0, 0))).astype(jnp.bfloat16)
    b_p = jnp.asarray(b, jnp.float32).reshape((1,))

    grid = (b_pad // tm,)

    out = pl.pallas_call(
        _discrimiter4_kernel,
        out_shape=jax.ShapeDtypeStruct((b_pad, 1), jnp.float32),
        grid=grid,
        in_specs=[
            # x: one (tm, n_pad) row tile per grid step (auto double-buffered DMA).
            pl.BlockSpec((tm, n_pad), lambda i: (i, 0)),
            # w: single block, resident in VMEM across all grid steps.
            pl.BlockSpec((n_pad, 1), lambda i: (0, 0)),
            # bias: scalar in SMEM.
            pl.BlockSpec(memory_space=pltpu.MemorySpace.SMEM),
        ],
        out_specs=pl.BlockSpec((tm, 1), lambda i: (i, 0)),
        compiler_params=pltpu.CompilerParams(
            dimension_semantics=("parallel",),   # shard row tiles across TCs (v7x megacore)
        ),
    )(x_p, w_p, b_p)

    return out[:B]


def init_params(key, n_latents=200):
    """Xavier-uniform weight (fan_in=n_latents, fan_out=1), zero bias.
    PyTorch fc1.weight is (1, n_latents); we store its transpose (n_latents, 1)."""
    bound = math.sqrt(6.0 / (n_latents + 1))
    w = jax.random.uniform(key, (n_latents, 1), jnp.float32, minval=-bound, maxval=bound)
    b = jnp.zeros((1,), jnp.float32)
    return w, b


if __name__ == "__main__":
    key = jax.random.PRNGKey(0)
    k_x, k_w = jax.random.split(key)

    n_latents = 200
    batch = 2

    x = jax.random.normal(k_x, (batch, n_latents), jnp.float32)
    w, b = init_params(k_w, n_latents)

    out = jax.block_until_ready(discrimiter4_forward(x, w, b))

    # Reference with the same bf16 input rounding the kernel uses.
    x_bf = x.astype(jnp.bfloat16).astype(jnp.float32)
    w_bf = w.astype(jnp.bfloat16).astype(jnp.float32)
    ref = jax.nn.sigmoid(x_bf @ w_bf + b.reshape(1, 1))

    assert out.shape == (batch, 1)
    assert jnp.allclose(out, ref, atol=1e-2), "mismatch vs reference"

    print("KERNEL_OK")
</pallas_src>

<mosaic_0001>
module attributes {stable_mosaic.version = 11 : i64} {
  func.func @_discrimiter4_kernel(%arg0: i32, %arg1: memref<8x256xbf16, #tpu.memory_space<vmem>>, %arg2: memref<256x1xbf16, #tpu.memory_space<vmem>>, %arg3: memref<1xf32, #tpu.memory_space<smem>>, %arg4: memref<8x1xf32, #tpu.memory_space<vmem>>) attributes {dimension_semantics = [#tpu.dimension_semantics<parallel>], iteration_bounds = array<i64: 1>, scalar_prefetch = 0 : i64, scratch_operands = 0 : i64, tpu.core_type = #tpu.core_type<tc>, window_params = [{transform_indices = @transform_0, window_bounds = array<i64: 8, 256>}, {pipeline_mode = #tpu.pipeline_mode<synchronous>, transform_indices = @transform_1, window_bounds = array<i64: 256, 1>}, {transform_indices = @transform_2, window_bounds = array<i64: 1>}, {transform_indices = @transform_3, window_bounds = array<i64: 8, 1>}]} {
    %c0 = arith.constant 0 : index
    %c0_0 = arith.constant 0 : index
    %0 = vector.load %arg1[%c0, %c0_0] : memref<8x256xbf16, #tpu.memory_space<vmem>>, vector<8x256xbf16>
    %c0_1 = arith.constant 0 : index
    %c0_2 = arith.constant 0 : index
    %1 = vector.load %arg2[%c0_1, %c0_2] : memref<256x1xbf16, #tpu.memory_space<vmem>>, vector<256x1xbf16>
    %cst = arith.constant dense<0.000000e+00> : vector<8x1xf32>
    %2 = tpu.matmul %0, %1, %cst {dimension_numbers = #tpu.dot_dimension_numbers<[1], [0], [0], [1], [0, 0, 1, 1], [], []>} : vector<8x256xbf16>, vector<256x1xbf16>, vector<8x1xf32> -> vector<8x1xf32>
    %c0_3 = arith.constant 0 : index
    %3 = memref.load %arg3[%c0_3] : memref<1xf32, #tpu.memory_space<smem>>
    %4 = vector.broadcast %3 : f32 to vector<8x1xf32>
    %5 = arith.addf %2, %4 : vector<8x1xf32>
    %cst_4 = arith.constant 0.000000e+00 : f32
    %6 = vector.broadcast %cst_4 : f32 to vector<8x1xf32>
    %7 = arith.subf %6, %5 : vector<8x1xf32>
    %8 = math.exp %7 : vector<8x1xf32>
    %cst_5 = arith.constant 1.000000e+00 : f32
    %9 = vector.broadcast %cst_5 : f32 to vector<8x1xf32>
    %10 = arith.addf %9, %8 : vector<8x1xf32>
    %11 = tpu.reciprocal %10 {approx = true} : vector<8x1xf32> -> vector<8x1xf32>
    %c0_6 = arith.constant 0 : index
    %c0_7 = arith.constant 0 : index
    %12 = vector.load %arg4[%c0_6, %c0_7] : memref<8x1xf32, #tpu.memory_space<vmem>>, vector<8x1xf32>
    tpu.vector_store %arg4[%c0_6, %c0_7], %11 {strides = array<i32>} : memref<8x1xf32, #tpu.memory_space<vmem>>, vector<8x1xf32>,
    return
  }
  func.func @transform_0(%arg0: i32) -> (i32, i32) {
    %c0_i32 = arith.constant 0 : i32
    %c0_i32_0 = arith.constant 0 : i32
    return %arg0, %c0_i32 : i32, i32
  }
  func.func @transform_1(%arg0: i32) -> (i32, i32) {
    %c0_i32 = arith.constant 0 : i32
    %c0_i32_0 = arith.constant 0 : i32
    %c0_i32_1 = arith.constant 0 : i32
    return %c0_i32, %c0_i32_0 : i32, i32
  }
  func.func @transform_2(%arg0: i32) -> i32 {
    %c0_i32 = arith.constant 0 : i32
    %c0_i32_0 = arith.constant 0 : i32
    return %c0_i32 : i32
  }
  func.func @transform_3(%arg0: i32) -> (i32, i32) {
    %c0_i32 = arith.constant 0 : i32
    %c0_i32_0 = arith.constant 0 : i32
    return %arg0, %c0_i32 : i32, i32
  }
}

</mosaic_0001>

<bundles_post_ra>
// kernel: tpu_custom_call.1
= control target key start
LH: loop header
LB: loop body
LE: loop exit
PB: predicated region body
PF: predicated region fallthrough
CT: control target
= control target key end

     0   :  { %vm199_vm0 = vcmask 7168   ;;  %s344_s1 = inlined_call_operand.vmem [shape: bf16[256,1], index: 1, kind: input, shape index: {}]   ;;  %s345_s0 = inlined_call_operand.vmem [shape: bf16[8,256], index: 0, kind: input, shape index: {}]   ;;  %s346_s2 = inlined_call_operand.<no memory space> [shape: f32[1], index: 2, kind: input, shape index: {}]   ;;  %s347_s3 = inlined_call_operand.vmem [shape: f32[8,1], index: 3, kind: output, shape index: {}]  }
   0x1   :  { %v245_v0 = vld [vmem:[%s344_s1 + $0x40] sm:$0xff]   ;;  %v247_v2 = vld [vmem:[%s344_s1 + $0x48] sm:$0xff]   ;;  %v249_v4 = vld [vmem:[%s344_s1 + $0x50] sm:$0xff]   ;;  %v50_v20 = vstv %s346_s2 }
   0x2   :  { %v246_v1 = vld [vmem:[%s344_s1] sm:$0xff]   ;;  %223 = vmatprep.subr.bf16.mxu0 %v245_v0  ;;  %v248_v3 = vld [vmem:[%s344_s1 + $0x8] sm:$0xff]   ;;  %v250_v5 = vld [vmem:[%s344_s1 + $0x10] sm:$0xff]  }
   0x3   :  { %224 = vmatpush3.bf16.msra.mxu0 %v246_v1  ;;  %v251_v6 = vld [vmem:[%s344_s1 + $0x58] sm:$0xff]   ;;  %v253_v8 = vld [vmem:[%s344_s1 + $0x60] sm:$0xff]   ;;  %v255_v10 = vld [vmem:[%s344_s1 + $0x68] sm:$0xff]  }
   0x4   :  { %225 = vmatprep.subr.bf16.mxu0 %v247_v2  ;;  %v252_v7 = vld [vmem:[%s344_s1 + $0x18] sm:$0xff]   ;;  %v254_v9 = vld [vmem:[%s344_s1 + $0x20] sm:$0xff]   ;;  %v256_v13 = vld [vmem:[%s344_s1 + $0x28] sm:$0xff]  }
   0x5   :  { %v16_v11 = vld [vmem:[%s345_s0] sm:$0xff]  ;;  %v257_v14 = vld [vmem:[%s344_s1 + $0x70] sm:$0xff]   ;;  %v259_v16 = vld [vmem:[%s344_s1 + $0x78] sm:$0xff]  }
   0x6   :  { %v206_v12 = vcombine.high %v16_v11, %v16_v11  ;;  %v258_v15 = vld [vmem:[%s344_s1 + $0x30] sm:$0xff]   ;;  %v260_v17 = vld [vmem:[%s344_s1 + $0x38] sm:$0xff]   ;;  %v205_v18 = vcombine.low %v16_v11, %v16_v11 }
   0x7   :  { %226 = vmatpush3.bf16.msra.mxu0 %v248_v3 }
   0x8   :  { %227 = vmatprep.subr.bf16.mxu0 %v249_v4  ;;  %186 = vmatprep.mubr.bf16.mxu0 %v206_v12 }
   0xb   :  { %228 = vmatpush3.bf16.msra.mxu0 %v250_v5 }
   0xc   :  { %229 = vmatprep.subr.bf16.mxu0 %v251_v6 }
   0xf   :  { %230 = vmatpush3.bf16.msra.mxu0 %v252_v7 }
  0x10   :  { %231 = vmatprep.subr.bf16.mxu0 %v253_v8 }
  0x13   :  { %232 = vmatpush3.bf16.msra.mxu0 %v254_v9 }
  0x14   :  { %233 = vmatprep.subr.bf16.mxu0 %v255_v10 }
  0x17   :  { %234 = vmatpush3.bf16.msra.mxu0 %v256_v13 }
  0x18   :  { %235 = vmatprep.subr.bf16.mxu0 %v257_v14 }
  0x1b   :  { %236 = vmatpush3.bf16.msra.mxu0 %v258_v15 }
  0x1c   :  { %237 = vmatprep.subr.bf16.mxu0 %v259_v16 }
  0x1f   :  { %238 = vmatpush3.bf16.msra.mxu0 %v260_v17 }
  0x22   :  { %187 = vmatmul.mubr.bf16.vlgmr.msra.gmra.mrb[0].mxu0 %v205_v18 }
  0xf5   :  { %v239_v19 = vpop.f32.mrb[0].mxu0 }
  0xf6   :  { %v240_v21 = vpop.f32.mrb[1].mxu0 }
  0xf7   :  { %v241_v22 = vadd.f32 %v240_v21, %v239_v19  ;;  %v242_v23 = vpop.f32.mrb[2].mxu0 }
  0xf8   :  { %v243_v24 = vpop.f32.mrb[3].mxu0 }
  0xf9   :  { %v189_v25 = vadd.f32 %v241_v22, %v50_v20 }
  0xfb   :  { %v194_v26 = vsub.f32 0.0, %v189_v25 }
  0xfd   :  { %v195_v27 = vmul.f32 1.442695, %v194_v26 }
  0xff   :  { %263 = vpow2.f32 %v195_v27 }
 0x109   :  { %v264_v28 = vpop.eup %263 }
 0x10a   :  { %v197_v29 = vadd.f32 1.0, %v264_v28 }
 0x10c   :  { %265 = vrcp.f32 %v197_v29 }
 0x116   :  { %v266_v30 = vpop.eup %265 }
 0x117   :  { %200 = vst.msk [vmem:[%s347_s3] sm:$0xff] %vm199_vm0, %v266_v30 }

</bundles_post_ra>
